<compile_context>
chip_gen: v7x
topology: tpu7x:2x2x1
jax: 0.10.0
libtpu: 0.0.40
codegen_flags: <defaults>
</compile_context>

<pallas_src>
import math
from functools import partial

import jax
import jax.numpy as jnp
from jax.experimental import pallas as pl
from jax.experimental.pallas import tpu as pltpu

LN_EPS = 1e-5  # PyTorch nn.LayerNorm default


# ----------------------------- Pallas kernel --------------------------------

def _block_kernel(x_ref, vec_ref, qkv_w_ref, proj_w_ref, fc1_w_ref, fc1_b_ref,
                  fc2_w_ref, o_ref, *, num_heads, head_dim):
    H, D = num_heads, head_dim

    x = x_ref[0]                                  # (N, C) f32 (one batch element)
    N, C = x.shape

    vec = vec_ref[...]                            # (6, C) f32 packed small vectors
    ln1_g, ln1_b = vec[0:1, :], vec[1:2, :]
    ln2_g, ln2_b = vec[2:3, :], vec[3:4, :]
    proj_b, fc2_b = vec[4:5, :], vec[5:6, :]

    # ---------------- LayerNorm 1 (f32) ----------------
    mu = jnp.mean(x, axis=-1, keepdims=True)
    xc = x - mu
    var = jnp.mean(xc * xc, axis=-1, keepdims=True)
    xn = xc * jax.lax.rsqrt(var + LN_EPS) * ln1_g + ln1_b

    # ---------------- QKV projection (bf16 MXU, f32 acc) ----------------
    # The 1/sqrt(D) softmax scale is already folded into the Q columns of
    # qkv_w (done once at weight-prep time).
    qkv = jnp.dot(xn.astype(jnp.bfloat16), qkv_w_ref[...],
                  preferred_element_type=jnp.float32)            # (N, 3*H*D)

    # Single head-major relayout: (N, 3H, D) -> (3H, N, D). Leading-dim slices
    # below are free — no per-head lane shuffles.
    qkv_h = jnp.transpose(qkv.reshape(N, 3 * H, D), (1, 0, 2)).astype(jnp.bfloat16)
    q = qkv_h[:H]                                 # (H, N, D), already scaled
    k = qkv_h[H:2 * H]                            # (H, N, D)
    v = qkv_h[2 * H:]                             # (H, N, D)

    # ---------------- batched-head self attention ----------------
    s = jnp.einsum('hqd,hkd->hqk', q, k,
                   preferred_element_type=jnp.float32)           # (H, N, N) f32
    s = s - jnp.max(s, axis=-1, keepdims=True)
    p = jnp.exp(s)
    p = p * pl.reciprocal(jnp.sum(p, axis=-1, keepdims=True), approx=True)

    o = jnp.einsum('hqk,hkd->hqd', p.astype(jnp.bfloat16), v,
                   preferred_element_type=jnp.float32)           # (H, N, D) f32

    # Fused concat + output projection:
    #   proj(concat_h O_h) = sum_h O_h @ W_proj[h]   with W_proj viewed (H, D, C)
    proj_h = jnp.einsum('hqd,hdc->hqc', o.astype(jnp.bfloat16), proj_w_ref[...],
                        preferred_element_type=jnp.float32)      # (H, N, C)
    attn_out = jnp.sum(proj_h, axis=0) + proj_b                  # (N, C)

    # ---------------- residual 1 ----------------
    x = x + attn_out

    # ---------------- LayerNorm 2 (f32) ----------------
    mu2 = jnp.mean(x, axis=-1, keepdims=True)
    xc2 = x - mu2
    var2 = jnp.mean(xc2 * xc2, axis=-1, keepdims=True)
    xn2 = xc2 * jax.lax.rsqrt(var2 + LN_EPS) * ln2_g + ln2_b

    # ---------------- MLP: fc1 -> GELU -> fc2 ----------------
    h1 = jnp.dot(xn2.astype(jnp.bfloat16), fc1_w_ref[...],
                 preferred_element_type=jnp.float32) + fc1_b_ref[...]   # (N, hid)
    # TODO(synk): PyTorch nn.GELU default is the exact erf GELU; tanh
    # approximation is used here since tanh has a guaranteed Mosaic lowering.
    a = 0.5 * h1 * (1.0 + jnp.tanh(0.7978845608028654
                                   * (h1 + 0.044715 * h1 * h1 * h1)))
    h2 = jnp.dot(a.astype(jnp.bfloat16), fc2_w_ref[...],
                 preferred_element_type=jnp.float32) + fc2_b            # (N, C)

    # ---------------- residual 2 ----------------
    o_ref[0] = (x + h2).astype(o_ref.dtype)


# ------------------------------- wrappers -------------------------------------

def prepare_block_params(params, *, num_heads, head_dim):
    """One-time weight preparation (outside jit / the hot path):
       - bf16 casts of all matmul weights (halves their HBM->VMEM bytes, no
         per-call cast traffic),
       - softmax scale folded into the Q columns of the qkv weight,
       - proj weight reshaped head-major (H, D, C) for the fused concat+proj,
       - the six (1, C) LN/bias vectors packed into one (6, C) array."""
    H, D = num_heads, head_dim
    HD = H * D
    scale = float(D) ** -0.5
    qkv_w = params["qkv_w"]
    C = qkv_w.shape[0]
    qkv_w = jnp.concatenate([qkv_w[:, :HD] * scale, qkv_w[:, HD:]], axis=1)
    vec = jnp.concatenate([params["ln1_g"], params["ln1_b"],
                           params["ln2_g"], params["ln2_b"],
                           params["proj_b"], params["fc2_b"]], axis=0)  # (6, C)
    return {
        "vec": vec.astype(jnp.float32),
        "qkv_w": qkv_w.astype(jnp.bfloat16),                          # (C, 3HD)
        "proj_w": params["proj_w"].reshape(H, D, C).astype(jnp.bfloat16),  # (H,D,C)
        "fc1_w": params["fc1_w"].astype(jnp.bfloat16),                # (C, hidden)
        "fc1_b": params["fc1_b"].astype(jnp.float32),                 # (1, hidden)
        "fc2_w": params["fc2_w"].astype(jnp.bfloat16),                # (hidden, C)
    }


def block_forward(x, prep, *, num_heads, head_dim):
    """x: (B, N, C) float32 -> (B, N, C) float32. Fused pre-LN transformer block.
       `prep` is the output of prepare_block_params (call it once, reuse)."""
    B, N, C = x.shape
    H, D = num_heads, head_dim
    HD = H * D
    hidden = prep["fc1_w"].shape[1]

    # Weights/biases never change across grid steps: constant index_map and a
    # single VMEM buffer (no pointless double-buffering of ~constant blocks).
    def const2(shape):
        return pl.BlockSpec(shape, lambda b: (0, 0), pipeline_mode=pl.Buffered(1))

    def const3(shape):
        return pl.BlockSpec(shape, lambda b: (0, 0, 0), pipeline_mode=pl.Buffered(1))

    # Explicit VMEM budget sized from the resident set (weights single-buffered,
    # x/out double-buffered, f32 working set with slack), capped with headroom
    # under v7x's 64 MiB physical VMEM.
    w_bytes = 2 * (C * 3 * HD + HD * C + C * hidden + hidden * C)        # bf16 weights
    vec_bytes = 4 * (6 * C + hidden)
    io_bytes = 2 * 2 * 4 * N * C                                         # x + out, 2 bufs
    work_bytes = 4 * (2 * N * 3 * HD + 2 * H * N * N + H * N * D
                      + H * N * C + 2 * N * hidden + 4 * N * C)
    vmem_limit = int(min(max(2 * (w_bytes + vec_bytes + io_bytes + work_bytes),
                             16 * 1024 * 1024), 56 * 1024 * 1024))

    kernel = partial(_block_kernel, num_heads=H, head_dim=D)

    return pl.pallas_call(
        kernel,
        out_shape=jax.ShapeDtypeStruct((B, N, C), x.dtype),
        grid_spec=pltpu.PrefetchScalarGridSpec(
            num_scalar_prefetch=0,
            grid=(B,),
            in_specs=[
                pl.BlockSpec((1, N, C), lambda b: (b, 0, 0)),   # x (one batch elem)
                const2((6, C)),            # packed ln1_g/ln1_b/ln2_g/ln2_b/proj_b/fc2_b
                const2((C, 3 * HD)),       # qkv weight (scale folded into Q cols)
                const3((H, D, C)),         # proj weight, head-major
                const2((C, hidden)),       # fc1 weight
                const2((1, hidden)),       # fc1 bias
                const2((hidden, C)),       # fc2 weight
            ],
            out_specs=pl.BlockSpec((1, N, C), lambda b: (b, 0, 0)),
        ),
        compiler_params=pltpu.CompilerParams(
            dimension_semantics=("parallel",),   # batch axis -> both TCs on v7x
            vmem_limit_bytes=vmem_limit,
        ),
    )(x, prep["vec"], prep["qkv_w"], prep["proj_w"], prep["fc1_w"],
      prep["fc1_b"], prep["fc2_w"])


# --------------------------- pure-JAX reference -------------------------------

def _block_reference(x, p, num_heads, head_dim):
    H, D = num_heads, head_dim
    B, N, C = x.shape

    def ln(v, g, b):
        mu = v.mean(-1, keepdims=True)
        var = ((v - mu) ** 2).mean(-1, keepdims=True)
        return (v - mu) / jnp.sqrt(var + LN_EPS) * g + b

    xn = ln(x, p["ln1_g"], p["ln1_b"])
    qkv = xn @ p["qkv_w"]                                    # (B, N, 3*H*D)
    qkv = qkv.reshape(B, N, 3, H, D).transpose(2, 0, 3, 1, 4)
    q, k, v = qkv[0], qkv[1], qkv[2]                         # (B, H, N, D)
    attn = (q * (float(D) ** -0.5)) @ jnp.swapaxes(k, -1, -2)
    attn = jax.nn.softmax(attn, axis=-1)
    out = (attn @ v).transpose(0, 2, 1, 3).reshape(B, N, H * D)
    out = out @ p["proj_w"] + p["proj_b"]
    x = x + out
    xn2 = ln(x, p["ln2_g"], p["ln2_b"])
    h1 = xn2 @ p["fc1_w"] + p["fc1_b"]
    a = 0.5 * h1 * (1.0 + jnp.tanh(0.7978845608028654 * (h1 + 0.044715 * h1 ** 3)))
    return x + a @ p["fc2_w"] + p["fc2_b"]


# --------------------------------- params -------------------------------------

def init_params(key, dim=32, num_heads=4, head_dim=8, mlp_ratio=4.0):
    hd = num_heads * head_dim
    hidden = int(dim * mlp_ratio)
    ks = jax.random.split(key, 5)

    def lin(k, fan_in, fan_out):
        return jax.random.normal(k, (fan_in, fan_out), jnp.float32) / math.sqrt(fan_in)

    return {
        "ln1_g": jnp.ones((1, dim), jnp.float32),
        "ln1_b": jnp.zeros((1, dim), jnp.float32),
        "qkv_w": lin(ks[0], dim, 3 * hd),          # == torch qkv.weight.T, no bias
        "proj_w": lin(ks[1], hd, dim),             # == torch proj.weight.T
        "proj_b": jax.random.normal(ks[2], (1, dim), jnp.float32) * 0.02,
        "ln2_g": jnp.ones((1, dim), jnp.float32),
        "ln2_b": jnp.zeros((1, dim), jnp.float32),
        "fc1_w": lin(ks[3], dim, hidden),
        "fc1_b": jnp.zeros((1, hidden), jnp.float32),
        "fc2_w": lin(ks[4], hidden, dim),
        "fc2_b": jnp.zeros((1, dim), jnp.float32),
    }


if __name__ == "__main__":
    # Small config consistent with the module: batch=2, seq=8, dim=32,
    # num_heads=4, head_dim=8 (mlp hidden = 128).
    B, N, DIM, HEADS, HEAD_DIM = 2, 8, 32, 4, 8

    key = jax.random.PRNGKey(0)
    kx, kp = jax.random.split(key)
    x = jax.random.normal(kx, (B, N, DIM), jnp.float32)
    params = init_params(kp, dim=DIM, num_heads=HEADS, head_dim=HEAD_DIM)

    # One-time weight prep (bf16 cast, scale fold, packing) — outside the hot path.
    prep = prepare_block_params(params, num_heads=HEADS, head_dim=HEAD_DIM)

    out = block_forward(x, prep, num_heads=HEADS, head_dim=HEAD_DIM)
    out = jax.block_until_ready(out)

    assert out.shape == (B, N, DIM), out.shape
    assert bool(jnp.all(jnp.isfinite(out)))

    # Sanity check against a pure-JAX f32 reference (loose tolerance: bf16 MXU
    # operands, folded bf16 scale and approx softmax reciprocal are intentional).
    ref = _block_reference(x, params, HEADS, HEAD_DIM)
    assert bool(jnp.allclose(out, ref, atol=2e-1, rtol=2e-1)), \
        float(jnp.max(jnp.abs(out - ref)))

    print("KERNEL_OK")
</pallas_src>

<mosaic_0001>
module attributes {stable_mosaic.version = 11 : i64} {
  func.func @_block_kernel(%arg0: i32, %arg1: memref<1x8x32xf32, #tpu.memory_space<vmem>>, %arg2: memref<6x32xf32, #tpu.memory_space<vmem>>, %arg3: memref<32x96xbf16, #tpu.memory_space<vmem>>, %arg4: memref<4x8x32xbf16, #tpu.memory_space<vmem>>, %arg5: memref<32x128xbf16, #tpu.memory_space<vmem>>, %arg6: memref<1x128xf32, #tpu.memory_space<vmem>>, %arg7: memref<128x32xbf16, #tpu.memory_space<vmem>>, %arg8: memref<1x8x32xf32, #tpu.memory_space<vmem>>) attributes {dimension_semantics = [#tpu.dimension_semantics<parallel>], iteration_bounds = array<i64: 2>, scalar_prefetch = 0 : i64, scratch_operands = 0 : i64, tpu.core_type = #tpu.core_type<tc>, window_params = [{transform_indices = @transform_0, window_bounds = array<i64: 1, 8, 32>}, {pipeline_mode = #tpu.pipeline_mode<synchronous>, transform_indices = @transform_1, window_bounds = array<i64: 6, 32>}, {pipeline_mode = #tpu.pipeline_mode<synchronous>, transform_indices = @transform_2, window_bounds = array<i64: 32, 96>}, {pipeline_mode = #tpu.pipeline_mode<synchronous>, transform_indices = @transform_3, window_bounds = array<i64: 4, 8, 32>}, {pipeline_mode = #tpu.pipeline_mode<synchronous>, transform_indices = @transform_4, window_bounds = array<i64: 32, 128>}, {pipeline_mode = #tpu.pipeline_mode<synchronous>, transform_indices = @transform_5, window_bounds = array<i64: 1, 128>}, {pipeline_mode = #tpu.pipeline_mode<synchronous>, transform_indices = @transform_6, window_bounds = array<i64: 128, 32>}, {transform_indices = @transform_7, window_bounds = array<i64: 1, 8, 32>}]} {
    %c0 = arith.constant 0 : index
    %c0_0 = arith.constant 0 : index
    %c0_1 = arith.constant 0 : index
    %0 = vector.load %arg1[%c0, %c0_0, %c0_1] : memref<1x8x32xf32, #tpu.memory_space<vmem>>, vector<1x8x32xf32>
    %1 = vector.shape_cast %0 : vector<1x8x32xf32> to vector<8x32xf32>
    %c0_2 = arith.constant 0 : index
    %c0_3 = arith.constant 0 : index
    %2 = vector.load %arg2[%c0_2, %c0_3] : memref<6x32xf32, #tpu.memory_space<vmem>>, vector<6x32xf32>
    %3 = vector.extract_strided_slice %2 {offsets = [0, 0], sizes = [1, 32], strides = [1, 1]} : vector<6x32xf32> to vector<1x32xf32>
    %4 = vector.extract_strided_slice %2 {offsets = [1, 0], sizes = [1, 32], strides = [1, 1]} : vector<6x32xf32> to vector<1x32xf32>
    %5 = vector.extract_strided_slice %2 {offsets = [2, 0], sizes = [1, 32], strides = [1, 1]} : vector<6x32xf32> to vector<1x32xf32>
    %6 = vector.extract_strided_slice %2 {offsets = [3, 0], sizes = [1, 32], strides = [1, 1]} : vector<6x32xf32> to vector<1x32xf32>
    %7 = vector.extract_strided_slice %2 {offsets = [4, 0], sizes = [1, 32], strides = [1, 1]} : vector<6x32xf32> to vector<1x32xf32>
    %8 = vector.extract_strided_slice %2 {offsets = [5, 0], sizes = [1, 32], strides = [1, 1]} : vector<6x32xf32> to vector<1x32xf32>
    %cst = arith.constant dense<0.000000e+00> : vector<8xf32>
    %9 = vector.multi_reduction <add>, %1, %cst [1] : vector<8x32xf32> to vector<8xf32>
    %10 = vector.shape_cast %9 : vector<8xf32> to vector<8x1xf32>
    %cst_4 = arith.constant 3.200000e+01 : f32
    %11 = vector.broadcast %cst_4 : f32 to vector<8x1xf32>
    %12 = arith.divf %10, %11 : vector<8x1xf32>
    %13 = vector.broadcast %12 : vector<8x1xf32> to vector<8x32xf32>
    %14 = arith.subf %1, %13 : vector<8x32xf32>
    %15 = arith.mulf %14, %14 : vector<8x32xf32>
    %cst_5 = arith.constant dense<0.000000e+00> : vector<8xf32>
    %16 = vector.multi_reduction <add>, %15, %cst_5 [1] : vector<8x32xf32> to vector<8xf32>
    %17 = vector.shape_cast %16 : vector<8xf32> to vector<8x1xf32>
    %cst_6 = arith.constant 3.200000e+01 : f32
    %18 = vector.broadcast %cst_6 : f32 to vector<8x1xf32>
    %19 = arith.divf %17, %18 : vector<8x1xf32>
    %cst_7 = arith.constant 9.99999974E-6 : f32
    %20 = vector.broadcast %cst_7 : f32 to vector<8x1xf32>
    %21 = arith.addf %19, %20 : vector<8x1xf32>
    %22 = math.rsqrt %21 : vector<8x1xf32>
    %23 = vector.broadcast %22 : vector<8x1xf32> to vector<8x32xf32>
    %24 = arith.mulf %14, %23 : vector<8x32xf32>
    %25 = vector.broadcast %3 : vector<1x32xf32> to vector<8x32xf32>
    %26 = arith.mulf %24, %25 : vector<8x32xf32>
    %27 = vector.broadcast %4 : vector<1x32xf32> to vector<8x32xf32>
    %28 = arith.addf %26, %27 : vector<8x32xf32>
    %29 = arith.truncf %28 : vector<8x32xf32> to vector<8x32xbf16>
    %c0_8 = arith.constant 0 : index
    %c0_9 = arith.constant 0 : index
    %30 = vector.load %arg3[%c0_8, %c0_9] : memref<32x96xbf16, #tpu.memory_space<vmem>>, vector<32x96xbf16>
    %cst_10 = arith.constant dense<0.000000e+00> : vector<8x96xf32>
    %31 = tpu.matmul %29, %30, %cst_10 {dimension_numbers = #tpu.dot_dimension_numbers<[1], [0], [0], [1], [0, 0, 1, 1], [], []>} : vector<8x32xbf16>, vector<32x96xbf16>, vector<8x96xf32> -> vector<8x96xf32>
    %32 = vector.shape_cast %31 : vector<8x96xf32> to vector<8x12x8xf32>
    %33 = tpu.transpose %32, [1, 0, 2] : vector<8x12x8xf32> -> vector<12x8x8xf32>
    %34 = arith.truncf %33 : vector<12x8x8xf32> to vector<12x8x8xbf16>
    %35 = vector.extract_strided_slice %34 {offsets = [0, 0, 0], sizes = [4, 8, 8], strides = [1, 1, 1]} : vector<12x8x8xbf16> to vector<4x8x8xbf16>
    %36 = vector.extract_strided_slice %34 {offsets = [4, 0, 0], sizes = [4, 8, 8], strides = [1, 1, 1]} : vector<12x8x8xbf16> to vector<4x8x8xbf16>
    %37 = vector.extract_strided_slice %34 {offsets = [8, 0, 0], sizes = [4, 8, 8], strides = [1, 1, 1]} : vector<12x8x8xbf16> to vector<4x8x8xbf16>
    "tpu.trace_start"() <{level = 10 : i32, message = "hqd,hkd->hqk"}> : () -> ()
    %cst_11 = arith.constant dense<0.000000e+00> : vector<4x8x8xf32>
    %38 = tpu.matmul %35, %36, %cst_11 {dimension_numbers = #tpu.dot_dimension_numbers<[2], [2], [1], [1], [0, 0, 0, 1, 1, 1], [0], [0]>} : vector<4x8x8xbf16>, vector<4x8x8xbf16>, vector<4x8x8xf32> -> vector<4x8x8xf32>
    "tpu.trace_stop"() : () -> ()
    %cst_12 = arith.constant dense<0xFF800000> : vector<4x8xf32>
    %39 = vector.multi_reduction <maximumf>, %38, %cst_12 [2] : vector<4x8x8xf32> to vector<4x8xf32>
    %40 = vector.shape_cast %39 : vector<4x8xf32> to vector<4x8x1xf32>
    %41 = vector.broadcast %40 : vector<4x8x1xf32> to vector<4x8x8xf32>
    %42 = arith.subf %38, %41 : vector<4x8x8xf32>
    %43 = math.exp %42 : vector<4x8x8xf32>
    %cst_13 = arith.constant dense<0.000000e+00> : vector<4x8xf32>
    %44 = vector.multi_reduction <add>, %43, %cst_13 [2] : vector<4x8x8xf32> to vector<4x8xf32>
    %45 = vector.shape_cast %44 : vector<4x8xf32> to vector<4x8x1xf32>
    %46 = tpu.reciprocal %45 {approx = true} : vector<4x8x1xf32> -> vector<4x8x1xf32>
    %47 = vector.broadcast %46 : vector<4x8x1xf32> to vector<4x8x8xf32>
    %48 = arith.mulf %43, %47 : vector<4x8x8xf32>
    %49 = arith.truncf %48 : vector<4x8x8xf32> to vector<4x8x8xbf16>
    "tpu.trace_start"() <{level = 10 : i32, message = "hqk,hkd->hqd"}> : () -> ()
    %cst_14 = arith.constant dense<0.000000e+00> : vector<4x8x8xf32>
    %50 = tpu.matmul %49, %37, %cst_14 {dimension_numbers = #tpu.dot_dimension_numbers<[2], [1], [1], [2], [0, 0, 0, 1, 1, 2], [0], [0]>} : vector<4x8x8xbf16>, vector<4x8x8xbf16>, vector<4x8x8xf32> -> vector<4x8x8xf32>
    "tpu.trace_stop"() : () -> ()
    %51 = arith.truncf %50 : vector<4x8x8xf32> to vector<4x8x8xbf16>
    %c0_15 = arith.constant 0 : index
    %c0_16 = arith.constant 0 : index
    %c0_17 = arith.constant 0 : index
    %52 = vector.load %arg4[%c0_15, %c0_16, %c0_17] : memref<4x8x32xbf16, #tpu.memory_space<vmem>>, vector<4x8x32xbf16>
    "tpu.trace_start"() <{level = 10 : i32, message = "hqd,hdc->hqc"}> : () -> ()
    %cst_18 = arith.constant dense<0.000000e+00> : vector<4x8x32xf32>
    %53 = tpu.matmul %51, %52, %cst_18 {dimension_numbers = #tpu.dot_dimension_numbers<[2], [1], [1], [2], [0, 0, 0, 1, 1, 2], [0], [0]>} : vector<4x8x8xbf16>, vector<4x8x32xbf16>, vector<4x8x32xf32> -> vector<4x8x32xf32>
    "tpu.trace_stop"() : () -> ()
    %cst_19 = arith.constant dense<0.000000e+00> : vector<8x32xf32>
    %54 = vector.multi_reduction <add>, %53, %cst_19 [0] : vector<4x8x32xf32> to vector<8x32xf32>
    %55 = vector.broadcast %7 : vector<1x32xf32> to vector<8x32xf32>
    %56 = arith.addf %54, %55 : vector<8x32xf32>
    %57 = arith.addf %1, %56 : vector<8x32xf32>
    %cst_20 = arith.constant dense<0.000000e+00> : vector<8xf32>
    %58 = vector.multi_reduction <add>, %57, %cst_20 [1] : vector<8x32xf32> to vector<8xf32>
    %59 = vector.shape_cast %58 : vector<8xf32> to vector<8x1xf32>
    %cst_21 = arith.constant 3.200000e+01 : f32
    %60 = vector.broadcast %cst_21 : f32 to vector<8x1xf32>
    %61 = arith.divf %59, %60 : vector<8x1xf32>
    %62 = vector.broadcast %61 : vector<8x1xf32> to vector<8x32xf32>
    %63 = arith.subf %57, %62 : vector<8x32xf32>
    %64 = arith.mulf %63, %63 : vector<8x32xf32>
    %cst_22 = arith.constant dense<0.000000e+00> : vector<8xf32>
    %65 = vector.multi_reduction <add>, %64, %cst_22 [1] : vector<8x32xf32> to vector<8xf32>
    %66 = vector.shape_cast %65 : vector<8xf32> to vector<8x1xf32>
    %cst_23 = arith.constant 3.200000e+01 : f32
    %67 = vector.broadcast %cst_23 : f32 to vector<8x1xf32>
    %68 = arith.divf %66, %67 : vector<8x1xf32>
    %cst_24 = arith.constant 9.99999974E-6 : f32
    %69 = vector.broadcast %cst_24 : f32 to vector<8x1xf32>
    %70 = arith.addf %68, %69 : vector<8x1xf32>
    %71 = math.rsqrt %70 : vector<8x1xf32>
    %72 = vector.broadcast %71 : vector<8x1xf32> to vector<8x32xf32>
    %73 = arith.mulf %63, %72 : vector<8x32xf32>
    %74 = vector.broadcast %5 : vector<1x32xf32> to vector<8x32xf32>
    %75 = arith.mulf %73, %74 : vector<8x32xf32>
    %76 = vector.broadcast %6 : vector<1x32xf32> to vector<8x32xf32>
    %77 = arith.addf %75, %76 : vector<8x32xf32>
    %78 = arith.truncf %77 : vector<8x32xf32> to vector<8x32xbf16>
    %c0_25 = arith.constant 0 : index
    %c0_26 = arith.constant 0 : index
    %79 = vector.load %arg5[%c0_25, %c0_26] : memref<32x128xbf16, #tpu.memory_space<vmem>>, vector<32x128xbf16>
    %cst_27 = arith.constant dense<0.000000e+00> : vector<8x128xf32>
    %80 = tpu.matmul %78, %79, %cst_27 {dimension_numbers = #tpu.dot_dimension_numbers<[1], [0], [0], [1], [0, 0, 1, 1], [], []>} : vector<8x32xbf16>, vector<32x128xbf16>, vector<8x128xf32> -> vector<8x128xf32>
    %c0_28 = arith.constant 0 : index
    %c0_29 = arith.constant 0 : index
    %81 = vector.load %arg6[%c0_28, %c0_29] : memref<1x128xf32, #tpu.memory_space<vmem>>, vector<1x128xf32>
    %82 = vector.broadcast %81 : vector<1x128xf32> to vector<8x128xf32>
    %83 = arith.addf %80, %82 : vector<8x128xf32>
    %cst_30 = arith.constant 5.000000e-01 : f32
    %84 = vector.broadcast %cst_30 : f32 to vector<8x128xf32>
    %85 = arith.mulf %84, %83 : vector<8x128xf32>
    %cst_31 = arith.constant 4.471500e-02 : f32
    %86 = vector.broadcast %cst_31 : f32 to vector<8x128xf32>
    %87 = arith.mulf %86, %83 : vector<8x128xf32>
    %88 = arith.mulf %87, %83 : vector<8x128xf32>
    %89 = arith.mulf %88, %83 : vector<8x128xf32>
    %90 = arith.addf %83, %89 : vector<8x128xf32>
    %cst_32 = arith.constant 0.797884583 : f32
    %91 = vector.broadcast %cst_32 : f32 to vector<8x128xf32>
    %92 = arith.mulf %91, %90 : vector<8x128xf32>
    %93 = math.tanh %92 : vector<8x128xf32>
    %cst_33 = arith.constant 1.000000e+00 : f32
    %94 = vector.broadcast %cst_33 : f32 to vector<8x128xf32>
    %95 = arith.addf %94, %93 : vector<8x128xf32>
    %96 = arith.mulf %85, %95 : vector<8x128xf32>
    %97 = arith.truncf %96 : vector<8x128xf32> to vector<8x128xbf16>
    %c0_34 = arith.constant 0 : index
    %c0_35 = arith.constant 0 : index
    %98 = vector.load %arg7[%c0_34, %c0_35] : memref<128x32xbf16, #tpu.memory_space<vmem>>, vector<128x32xbf16>
    %cst_36 = arith.constant dense<0.000000e+00> : vector<8x32xf32>
    %99 = tpu.matmul %97, %98, %cst_36 {dimension_numbers = #tpu.dot_dimension_numbers<[1], [0], [0], [1], [0, 0, 1, 1], [], []>} : vector<8x128xbf16>, vector<128x32xbf16>, vector<8x32xf32> -> vector<8x32xf32>
    %100 = vector.broadcast %8 : vector<1x32xf32> to vector<8x32xf32>
    %101 = arith.addf %99, %100 : vector<8x32xf32>
    %102 = arith.addf %57, %101 : vector<8x32xf32>
    %c0_37 = arith.constant 0 : index
    %c0_38 = arith.constant 0 : index
    %c0_39 = arith.constant 0 : index
    %103 = vector.load %arg8[%c0_37, %c0_38, %c0_39] : memref<1x8x32xf32, #tpu.memory_space<vmem>>, vector<1x8x32xf32>
    %104 = vector.shape_cast %103 : vector<1x8x32xf32> to vector<8x32xf32>
    %105 = vector.shape_cast %102 : vector<8x32xf32> to vector<1x8x32xf32>
    tpu.vector_store %arg8[%c0_37, %c0_38, %c0_39], %105 {strides = array<i32>} : memref<1x8x32xf32, #tpu.memory_space<vmem>>, vector<1x8x32xf32>,
    return
  }
  func.func @transform_0(%arg0: i32) -> (i32, i32, i32) {
    %c0_i32 = arith.constant 0 : i32
    %c0_i32_0 = arith.constant 0 : i32
    %c0_i32_1 = arith.constant 0 : i32
    return %arg0, %c0_i32, %c0_i32_0 : i32, i32, i32
  }
  func.func @transform_1(%arg0: i32) -> (i32, i32) {
    %c0_i32 = arith.constant 0 : i32
    %c0_i32_0 = arith.constant 0 : i32
    %c0_i32_1 = arith.constant 0 : i32
    return %c0_i32, %c0_i32_0 : i32, i32
  }
  func.func @transform_2(%arg0: i32) -> (i32, i32) {
    %c0_i32 = arith.constant 0 : i32
    %c0_i32_0 = arith.constant 0 : i32
    %c0_i32_1 = arith.constant 0 : i32
    return %c0_i32, %c0_i32_0 : i32, i32
  }
  func.func @transform_3(%arg0: i32) -> (i32, i32, i32) {
    %c0_i32 = arith.constant 0 : i32
    %c0_i32_0 = arith.constant 0 : i32
    %c0_i32_1 = arith.constant 0 : i32
    %c0_i32_2 = arith.constant 0 : i32
    return %c0_i32, %c0_i32_0, %c0_i32_1 : i32, i32, i32
  }
  func.func @transform_4(%arg0: i32) -> (i32, i32) {
    %c0_i32 = arith.constant 0 : i32
    %c0_i32_0 = arith.constant 0 : i32
    %c0_i32_1 = arith.constant 0 : i32
    return %c0_i32, %c0_i32_0 : i32, i32
  }
  func.func @transform_5(%arg0: i32) -> (i32, i32) {
    %c0_i32 = arith.constant 0 : i32
    %c0_i32_0 = arith.constant 0 : i32
    %c0_i32_1 = arith.constant 0 : i32
    return %c0_i32, %c0_i32_0 : i32, i32
  }
  func.func @transform_6(%arg0: i32) -> (i32, i32) {
    %c0_i32 = arith.constant 0 : i32
    %c0_i32_0 = arith.constant 0 : i32
    %c0_i32_1 = arith.constant 0 : i32
    return %c0_i32, %c0_i32_0 : i32, i32
  }
  func.func @transform_7(%arg0: i32) -> (i32, i32, i32) {
    %c0_i32 = arith.constant 0 : i32
    %c0_i32_0 = arith.constant 0 : i32
    %c0_i32_1 = arith.constant 0 : i32
    return %arg0, %c0_i32, %c0_i32_0 : i32, i32, i32
  }
}

</mosaic_0001>

<bundles_post_ra>
// kernel: tpu_custom_call.1
= control target key start
LH: loop header
LB: loop body
LE: loop exit
PB: predicated region body
PF: predicated region fallthrough
CT: control target
= control target key end

     0   :  { %12 = vsyncpa [#allocation3], 0  ;;  %s2486_s0 = inlined_call_operand.vmem [shape: f32[2,8,32], index: 0, kind: input, shape index: {}]   ;;  %s2487_s1 = inlined_call_operand.vmem [shape: f32[6,32], index: 1, kind: input, shape index: {}]   ;;  %s2488_s2 = inlined_call_operand.vmem [shape: bf16[32,96], index: 2, kind: input, shape index: {}]   ;;  %s2489_s3 = inlined_call_operand.vmem [shape: bf16[4,8,32], index: 3, kind: input, shape index: {}]   ;;  %s2490_s4 = inlined_call_operand.vmem [shape: bf16[32,128], index: 4, kind: input, shape index: {}]   ;;  %s2491_s5 = inlined_call_operand.vmem [shape: f32[1,128], index: 5, kind: input, shape index: {}]   ;;  %s2492_s6 = inlined_call_operand.vmem [shape: bf16[128,32], index: 6, kind: input, shape index: {}]   ;;  %s2493_s7 = inlined_call_operand.hbm [shape: f32[2,8,32], index: 7, kind: output, shape index: {}]  }
   0x1   :  { %14 = vsyncpa [#allocation3 + $0x1], 0  ;;  %s2124_s24 = smov 0   ;;  %s2126_s25 = smov 0  }
   0x2   :  { %s2128_s26 = smov 0   ;;  %s2130_s27 = smov 0  }
   0x3 LB: > { %s2145_s28 = sadd.s32 4294967295, %s2066_s27   ;;  %s1722_s29 = sadd.s32 4294967294, %s2066_s27   ;;  %s2066_s27 = sphi %s2130_s27, %s2499_s27   ;;  %s2062_s26 = sphi %s2128_s26, %s2498_s26   ;;  %s2058_s25 = sphi %s2126_s25, %s2497_s25   ;;  %s2054_s24 = sphi %s2124_s24, %s2496_s24  }
   0x4   : > { %s2149_s30 = sadd.s32 1, %s2066_s27   ;;  %s179_s8 = sadd.s32 1, %s2062_s26 }
   0x5   : > { %s176_s9 = ssub.s32 %s2066_s27, %s2149_s30  ;;  %p189_p0 = scmp.ne.s32.totalorder %s2062_s26, %s2058_s25 }
   0x6   : > { %p177_p1 = scmp.eq.s32.totalorder %s176_s9, 0  ;;  %p190_p2 = scmp.eq.s32.totalorder %s2145_s28, 1 }
   0x7   : > { %p195_p3 = scmp.ne.s32.totalorder %s2058_s25, %s2054_s24  ;;  %p196_p4 = scmp.eq.s32.totalorder %s1722_s29, 1 }
   0x8   : > { %s2160_s10 = scalar_select %p177_p1, %s2062_s26, %s179_s8  }
   0x9   : > { %p2162_p5 = por %p190_p2, %p189_p0  ;;  %p2166_p6 = por %p196_p4, %p195_p3 }
   0xa   : > { %p1725_p7 = scmp.ge.s32.totalorder %s2066_s27, 1  ;;  %p239_p8 = scmp.lt.s32.totalorder %s2066_s27, 3 }
   0xc   : > { %p240_p9 = pnand %p1725_p7, %p239_p8 }
   0xd   : > { %p270_p10 = scmp.lt.s32.totalorder (!%p240_p9), %s2145_s28, 1  ;;  %vm277_vm0 = vcmask (!%p240_p9), 261120   ;;  %v1970_v7 = vld [vmem:[%s2488_s2] sm:$0xff] (!%p240_p9)   ;;  %v2068_v8 = vmov (!%p240_p9), 0.0   ;;  %vm2069_vm1 = vmmov (!%p240_p9), 0   ;;  %v1971_v9 = vld [vmem:[%s2488_s2 + $0x8] sm:$0xff] (!%p240_p9)   ;;  %v292_v12 = vlaneseq (!%p240_p9) }
   0xe   : > { %243 = sbr.rel (%p240_p9) target bundleno = 2518 (0x9d6), region = 48  ;;  %1808 = vmatprep.subr.bf16.mxu1 (!%p240_p9), %v2068_v8  ;;  %1812 = vmatprep.mubr.msk.bf16.mxu1 (!%p240_p9), %vm2069_vm1, %v2068_v8  ;;  %v2203_v16 = vld [vmem:[%s2487_s1] sm:$0x3f] (!%p240_p9)  ;;  %s2070_s29 = smov (!%p240_p9), 80   ;;  %v2077_v29 = vmov (!%p240_p9), 1983009808  }
   0xf   : > { %1809 = vmatpush3.bf16.msra.mxu1 (!%p240_p9), %v1970_v7  ;;  %1834 = vmatprep.subr.bf16.mxu0 (!%p240_p9), %v2068_v8  ;;  %v2197_v14 = vshrl.u32 (!%p240_p9), %v292_v12, 7  ;;  %s2071_s8 = smov (!%p240_p9), 96   ;;  %s2072_s9 = smov (!%p240_p9), 88   ;;  %v399_v30 = vunpack.c.l.s4 (!%p240_p9), %v2077_v29  ;;  %v2078_v32 = vmov (!%p240_p9), 1934713408   ;;  %vm816_vm2 = vcmask (!%p240_p9), 64512  }
  0x10   : > { %1810 = vmatprep.subr.bf16.mxu1 (!%p240_p9), %v2068_v8  ;;  %1836 = vmatprep.mubr.msk.bf16.mxu0 (!%p240_p9), %vm2069_vm1, %v2068_v8  ;;  %s2075_s15 = smov (!%p240_p9), 112   ;;  %s2076_s16 = smov (!%p240_p9), 104   ;;  %v463_v33 = vunpack.c.l.s4 (!%p240_p9), %v2078_v32  ;;  %vm1052_vm3 = vcmask (!%p240_p9), 1043456  }
  0x11   : > { %v294_v15 = vsub.s32 (!%p240_p9), 0, %v2197_v14  ;;  %v299_v17 = vsub.s32 (!%p240_p9), 1, %v2197_v14  ;;  %v400_v34 = vunpack.c.0.s8 (!%p240_p9), %v399_v30  ;;  %s2080_s18 = smov (!%p240_p9), 48   ;;  %s2081_s19 = smov (!%p240_p9), 40  }
  0x12   : > { %v464_v37 = vunpack.c.0.s8 (!%p240_p9), %v463_v33  ;;  %s2082_s20 = smov (!%p240_p9), 56   ;;  %s267_s23 = sand.u32 (!%p240_p9), 1, %s2058_s25  }
  0x13   : > { %1811 = vmatpush3.bf16.msra.mxu1 (!%p240_p9), %v1971_v9  ;;  %v295_v18 = vrot.slane (!%p240_p9), %v2203_v16, %v294_v15  ;;  %v300_v21 = vrot.slane (!%p240_p9), %v2203_v16, %v299_v17  ;;  %v2221_v38 = vsub.s32 (!%p240_p9), %v400_v34, %v2197_v14 }
  0x14   : > { %1816 = vmatprep.subr.bf16.mxu1 (!%p240_p9), %v2068_v8  ;;  %v2224_v44 = vsub.s32 (!%p240_p9), %v464_v37, %v2197_v14 }
  0x15   : > { %s271_s13 = scalar_select %p270_p10, %s2145_s28, 1 }
  0x17   : > { %s1727_s14 = sshll.u32 %s271_s13, 3  ;;  %s2073_s13 = smov 72  }
  0x18   : > { %s273_s17 = scalar_lea.vmem %s2486_s0, %s1727_s14  ;;  %s2074_s14 = smov 120  }
  0x19   : > { %v2177_v0 = vld [vmem:[%s273_s17] sm:$0xff]  ;;  %s2079_s17 = smov 64  }
  0x1a   : > { %v278_v1 = vsel %vm277_vm0, %v2177_v0, 0.0 }
  0x1b   : > { %279 = vadd.xlane.f32.xlu0 %v278_v1 }
  0xa8   : > { %v280_v2 = vpop.xlane.xlu0 %279 }
  0xa9   : > { %v282_v3 = vmul.f32 0.03125, %v280_v2 }
  0xab   : > { %v283_v4 = vsub.f32 %v2177_v0, %v282_v3 }
  0xad   : > { %v284_v5 = vmul.f32 %v283_v4, %v283_v4 }
  0xaf   : > { %v285_v6 = vsel %vm277_vm0, %v284_v5, 0.0 }
  0xb0   : > { %286 = vadd.xlane.f32.xlu0 %v285_v6 }
 0x13d   : > { %v287_v10 = vpop.xlane.xlu0 %286 }
 0x13e   : > { %v288_v11 = vmul.f32 0.03125, %v287_v10 }
 0x140   : > { %v289_v13 = vadd.f32 1e-05, %v288_v11 }
 0x142   : > { %1982 = vrsqrt.f32 %v289_v13 }
 0x14c   : > { %v1983_v19 = vpop.eup %1982 }
 0x14d   : > { %v291_v20 = vmul.f32 %v1983_v19, %v283_v4 }
 0x14f   : > { %v296_v22 = vmul.f32 %v295_v18, %v291_v20 }
 0x151   : > { %v301_v23 = vadd.f32 %v300_v21, %v296_v22 }
 0x153   : > { %v302_v24 = vpack.c.bf16 %v301_v23, %v301_v23 }
 0x155   : > { %1813 = vmatmul.mubr.msk.bf16.vlgmr.msra.gmra.mrb[0].mxu1 %vm277_vm0, %v302_v24 }
 0x156   : > { %1818 = vmatprep.mubr.msk.bf16.mxu1 %vm2069_vm1, %v2068_v8 }
 0x228   : > { %v2211_v25 = vpop.f32.mrb[0].mxu1 }
 0x229   : > { %378 = vrot.lane.b32.xlu0 %v2211_v25, %s2070_s29  ;;  %372 = vrot.lane.b32.xlu1 %v2211_v25, %s2071_s8  ;;  %v1814_v26 = vpop.f32.mrb[1].mxu1  ;;  %s1726_s29 = sshll.u32 %s267_s23, 3  ;;  %s1766_s8 = sshll.u32 %s2145_s28, 7 }
 0x22a   : > { %v359_v27 = vpop.f32.mrb[2].mxu1  ;;  %s1650_s28 = scalar_lea.sflag [#allocation3], %s267_s23 }
 0x22b   : > { %v1815_v28 = vpop.f32.mrb[3].mxu1 }
 0x22d   : > { %375 = vrot.lane.b32.xlu1 %v2211_v25, %s2072_s9  ;;  %s269_s9 = scalar_lea.vmem [#allocation2], %s1726_s29 }
 0x231   : > { %381 = vrot.lane.b32.xlu1 %v2211_v25, %s2073_s13  ;;  %s1663_s13 = sshll.u32 %s269_s9, 4  ;;  %s2445_s13 = int_to_ptr.vmem [resolvable:$true] %s1663_s13 }
 0x235   : > { %363 = vrot.lane.b32.xlu1 %v2211_v25, %s2074_s14 }
 0x239   : > { %366 = vrot.lane.b32.xlu1 %v2211_v25, %s2075_s15 }
 0x23d   : > { %369 = vrot.lane.b32.xlu1 %v2211_v25, %s2076_s16  ;;  %s2443_s16 = scalar_lea.hbm %s2493_s7, %s1766_s8 }
 0x29b   : > { %v373_v31 = vpop.permute.xlu1 %372  ;;  %v379_v35 = vpop.permute.xlu0 %378 }
 0x29c   : > { %v428_v39 = vcombine.low %v373_v31, %v379_v35  ;;  %v429_v40 = vcombine.high %v373_v31, %v379_v35 }
 0x29e   : > { %v436_v45 = vrot.slane %v428_v39, %v2221_v38  ;;  %v443_v46 = vrot.slane %v429_v40, %v2221_v38 }
 0x29f   : > { %v376_v36 = vpop.permute.xlu1 %375 }
 0x2a3   : > { %v382_v41 = vpop.permute.xlu1 %381 }
 0x2a4   : > { %v444_v42 = vcombine.low %v376_v36, %v382_v41  ;;  %v445_v43 = vcombine.high %v376_v36, %v382_v41 }
 0x2a6   : > { %v452_v47 = vrot.slane %v444_v42, %v2221_v38  ;;  %v459_v48 = vrot.slane %v445_v43, %v2221_v38 }
 0x2a7   : > { %v364_v49 = vpop.permute.xlu1 %363 }
 0x2a8   : > { %v492_v50 = vcombine.low %v436_v45, %v452_v47  ;;  %v493_v51 = vcombine.high %v436_v45, %v452_v47  ;;  %v508_v52 = vcombine.low %v443_v46, %v459_v48  ;;  %v509_v53 = vcombine.high %v443_v46, %v459_v48 }
 0x2aa   : > { %v500_v54 = vrot.slane %v492_v50, %v2224_v44  ;;  %v507_v55 = vrot.slane %v493_v51, %v2224_v44  ;;  %v516_v56 = vrot.slane %v508_v52, %v2224_v44  ;;  %v523_v57 = vrot.slane %v509_v53, %v2224_v44 }
 0x2ab   : > { %v367_v58 = vpop.permute.xlu1 %366 }
 0x2ac   : > { %v1732_v59 = vcombine.low %v500_v54, %v507_v55  ;;  %v1734_v60 = vcombine.high %v500_v54, %v507_v55  ;;  %v1736_v61 = vcombine.low %v516_v56, %v523_v57  ;;  %v1738_v62 = vcombine.high %v516_v56, %v523_v57 }
 0x2ad   : > { %v396_v63 = vcombine.low %v2211_v25, %v367_v58  ;;  %v397_v1 = vcombine.high %v2211_v25, %v367_v58 }
 0x2ae   : > { %v615_v2 = vrot.slane %v1732_v59, %v2221_v38  ;;  %v631_v3 = vrot.slane %v1734_v60, %v2221_v38  ;;  %v647_v4 = vrot.slane %v1736_v61, %v2221_v38  ;;  %v663_v5 = vrot.slane %v1738_v62, %v2221_v38 }
 0x2af   : > { %v370_v6 = vpop.permute.xlu1 %369  ;;  %v404_v12 = vrot.slane %v396_v63, %v2221_v38  ;;  %v411_v13 = vrot.slane %v397_v1, %v2221_v38 }
 0x2b0   : > { %v412_v7 = vcombine.low %v364_v49, %v370_v6  ;;  %v413_v9 = vcombine.high %v364_v49, %v370_v6  ;;  %v680_v10 = vcombine.low %v615_v2, %v631_v3  ;;  %v712_v11 = vcombine.low %v647_v4, %v663_v5 }
 0x2b1   : > { %v681_v15 = vcombine.high %v615_v2, %v631_v3  ;;  %v713_v17 = vcombine.high %v647_v4, %v663_v5 }
 0x2b2   : > { %v420_v18 = vrot.slane %v412_v7, %v2221_v38  ;;  %v427_v19 = vrot.slane %v413_v9, %v2221_v38  ;;  %v688_v20 = vrot.slane %v680_v10, %v2224_v44  ;;  %v720_v21 = vrot.slane %v712_v11, %v2224_v44 }
 0x2b3   : > { %v695_v22 = vrot.slane %v681_v15, %v2224_v44  ;;  %v727_v23 = vrot.slane %v713_v17, %v2224_v44 }
 0x2b4   : > { %v460_v24 = vcombine.low %v404_v12, %v420_v18  ;;  %v461_v26 = vcombine.high %v404_v12, %v420_v18  ;;  %v476_v27 = vcombine.low %v411_v13, %v427_v19  ;;  %v477_v28 = vcombine.high %v411_v13, %v427_v19 }
 0x2b5   : > { %v732_v29 = vcombine.low %v688_v20, %v720_v21  ;;  %v735_v30 = vcombine.high %v695_v22, %v727_v23  ;;  %v733_v49 = vcombine.high %v688_v20, %v720_v21  ;;  %v734_v1 = vcombine.low %v695_v22, %v727_v23 }
 0x2b6   : > { %v468_v31 = vrot.slane %v460_v24, %v2224_v44  ;;  %v475_v32 = vrot.slane %v461_v26, %v2224_v44  ;;  %v484_v33 = vrot.slane %v476_v27, %v2224_v44  ;;  %v491_v34 = vrot.slane %v477_v28, %v2224_v44 }
 0x2b7   : > { %v808_v35 = vpack.c.bf16 %v732_v29, %v732_v29  ;;  %v811_v36 = vpack.c.bf16 %v735_v30, %v735_v30  ;;  %v809_v59 = vpack.c.bf16 %v733_v49, %v733_v49  ;;  %v810_v3 = vpack.c.bf16 %v734_v1, %v734_v1 }
 0x2b8   : > { %v1731_v37 = vcombine.low %v468_v31, %v475_v32  ;;  %v1733_v39 = vcombine.high %v468_v31, %v475_v32  ;;  %v1735_v40 = vcombine.low %v484_v33, %v491_v34  ;;  %v1737_v41 = vcombine.high %v484_v33, %v491_v34 }
 0x2b9   : > { %v821_v42 = vsel %vm816_vm2, %v808_v35, 0  ;;  %v959_v43 = vsel %vm816_vm2, %v811_v36, 0  ;;  %v867_v63 = vsel %vm816_vm2, %v809_v59, 0  ;;  %v913_v5 = vsel %vm816_vm2, %v810_v3, 0 }
 0x2ba   : > { %v608_v45 = vrot.slane %v1731_v37, %v2221_v38  ;;  %v624_v46 = vrot.slane %v1733_v39, %v2221_v38  ;;  %v640_v47 = vrot.slane %v1735_v40, %v2221_v38  ;;  %v656_v48 = vrot.slane %v1737_v41, %v2221_v38  ;;  %1817 = vmatpush3.bf16.xpose.msra.mxu1 %v821_v42 }
 0x2bb   : > { %1835 = vmatpush3.bf16.xpose.msra.mxu0 %v959_v43  ;;  %1822 = vmatprep.subr.bf16.mxu1 %v2068_v8 }
 0x2bc   : > { %v664_v50 = vcombine.low %v608_v45, %v624_v46  ;;  %v696_v51 = vcombine.low %v640_v47, %v656_v48  ;;  %v665_v52 = vcombine.high %v608_v45, %v624_v46  ;;  %v697_v53 = vcombine.high %v640_v47, %v656_v48  ;;  %1846 = vmatprep.subr.bf16.mxu0 %v2068_v8 }
 0x2be   : > { %v672_v54 = vrot.slane %v664_v50, %v2224_v44  ;;  %v704_v55 = vrot.slane %v696_v51, %v2224_v44  ;;  %v679_v56 = vrot.slane %v665_v52, %v2224_v44  ;;  %v711_v57 = vrot.slane %v697_v53, %v2224_v44 }
 0x2c0   : > { %v728_v58 = vcombine.low %v672_v54, %v704_v55  ;;  %v731_v60 = vcombine.high %v679_v56, %v711_v57  ;;  %v729_v2 = vcombine.high %v672_v54, %v704_v55  ;;  %v730_v6 = vcombine.low %v679_v56, %v711_v57 }
 0x2c2   : > { %v804_v61 = vpack.c.bf16 %v728_v58, %v728_v58  ;;  %v807_v62 = vpack.c.bf16 %v731_v60, %v731_v60  ;;  %v805_v4 = vpack.c.bf16 %v729_v2, %v729_v2  ;;  %v806_v7 = vpack.c.bf16 %v730_v6, %v730_v6 }
 0x2c4   : > { %1819 = vmatmul.mubr.msk.bf16.vlgmr.msra.gmra.mrb[4].mxu1 %vm816_vm2, %v804_v61  ;;  %1837 = vmatmul.mubr.msk.bf16.vlgmr.msra.gmra.mrb[0].mxu0 %vm816_vm2, %v807_v62 }
 0x2c5   : > { %1823 = vmatpush3.bf16.xpose.msra.mxu1 %v867_v63  ;;  %1824 = vmatprep.mubr.msk.bf16.mxu1 %vm2069_vm1, %v2068_v8 }
 0x2c6   : > { %1828 = vmatprep.subr.bf16.mxu1 %v2068_v8  ;;  %1848 = vmatprep.mubr.msk.bf16.mxu0 %vm2069_vm1, %v2068_v8 }
 0x2cc   : > { %1825 = vmatmul.mubr.msk.bf16.vlgmr.msra.gmra.mrb[8].mxu1 %vm816_vm2, %v805_v4 }
 0x2cd   : > { %1829 = vmatpush3.bf16.xpose.msra.mxu1 %v913_v5  ;;  %1830 = vmatprep.mubr.msk.bf16.mxu1 %vm2069_vm1, %v2068_v8 }
 0x2ce   : > { %1840 = vmatprep.subr.bf16.mxu1 %v2068_v8 }
 0x2d4   : > { %1831 = vmatmul.mubr.msk.bf16.vlgmr.msra.gmra.mrb[12].mxu1 %vm816_vm2, %v806_v7 }
 0x2d5   : > { %1842 = vmatprep.mubr.msk.bf16.mxu1 %vm2069_vm1, %v2068_v8 }
 0x397   : > { %v857_v9 = vpop.f32.mrb[4].mxu1  ;;  %v995_v10 = vpop.f32.mrb[0].mxu0 }
 0x398   : > { %v1820_v11 = vpop.f32.mrb[5].mxu1  ;;  %v1838_v12 = vpop.f32.mrb[1].mxu0  ;;  %v1001_v13 = vsel %vm816_vm2, %v857_v9, -inf  ;;  %v1010_v26 = vsel %vm816_vm2, %v995_v10, -inf }
 0x399   : > { %v998_v15 = vpop.f32.mrb[2].mxu0  ;;  %1002 = vmax.xlane.f32.xlu1 %v1001_v13  ;;  %v860_v17 = vpop.f32.mrb[6].mxu1 }
 0x39a   : > { %v1821_v18 = vpop.f32.mrb[7].mxu1  ;;  %v1839_v19 = vpop.f32.mrb[3].mxu0 }
 0x39f   : > { %v903_v20 = vpop.f32.mrb[8].mxu1 }
 0x3a0   : > { %v1826_v21 = vpop.f32.mrb[9].mxu1  ;;  %v1004_v22 = vsel %vm816_vm2, %v903_v20, -inf }
 0x3a1   : > { %1005 = vmax.xlane.f32.xlu0 %v1004_v22  ;;  %v906_v23 = vpop.f32.mrb[10].mxu1 }
 0x3a2   : > { %v1827_v24 = vpop.f32.mrb[11].mxu1 }
 0x3a5   : > { %1011 = vmax.xlane.f32.xlu0 %v1010_v26 }
 0x3a7   : > { %v949_v27 = vpop.f32.mrb[12].mxu1 }
 0x3a8   : > { %v1832_v28 = vpop.f32.mrb[13].mxu1  ;;  %v1007_v29 = vsel %vm816_vm2, %v949_v27, -inf }
 0x3a9   : > { %1008 = vmax.xlane.f32.xlu1 %v1007_v29  ;;  %v952_v30 = vpop.f32.mrb[14].mxu1 }
 0x3aa   : > { %v1833_v31 = vpop.f32.mrb[15].mxu1 }
 0x3ba   : > { %384 = vrot.lane.b32.xlu1 %v2211_v25, %s2079_s17  ;;  %s2004_s17 = scalar_lea.vmem %s2445_s13, 128 }
 0x3bb   : > { %p2005_p11 = scmp.ne.s32.totalorder %s2445_s13, %s2004_s17 }
 0x3bd   : > { %p2006_p12 = pnand %p2005_p11, %p2162_p5 }
 0x3bf   : > { %p2007_p13 = pneg %p2006_p12 }
 0x426   : > { %v1003_v32 = vpop.xlane.xlu1 %1002 }
 0x427   : > { %v1013_v33 = vsub.f32 %v857_v9, %v1003_v32 }
 0x429   : > { %v1017_v34 = vmul.f32 1.442695, %v1013_v33 }
 0x42b   : > { %1984 = vpow2.f32 %v1017_v34 }
 0x42e   : > { %v1006_v35 = vpop.xlane.xlu0 %1005 }
 0x42f   : > { %v1014_v36 = vsub.f32 %v903_v20, %v1006_v35 }
 0x431   : > { %v1019_v37 = vmul.f32 1.442695, %v1014_v36 }
 0x432   : > { %v1012_v43 = vpop.xlane.xlu0 %1011 }
 0x433   : > { %1986 = vpow2.f32 %v1019_v37  ;;  %v1016_v45 = vsub.f32 %v995_v10, %v1012_v43 }
 0x435   : > { %v2285_v39 = vpop.eup %1984  ;;  %v1023_v47 = vmul.f32 1.442695, %v1016_v45 }
 0x436   : > { %v1025_v40 = vsel %vm816_vm2, %v2285_v39, 0.0  ;;  %v1009_v46 = vpop.xlane.xlu1 %1008 }
 0x437   : > { %1026 = vadd.xlane.f32.xlu1 %v1025_v40  ;;  %v1015_v48 = vsub.f32 %v949_v27, %v1009_v46  ;;  %1988 = vpow2.f32 %v1023_v47 }
 0x439   : > { %v1021_v49 = vmul.f32 1.442695, %v1015_v48 }
 0x43b   : > { %1990 = vpow2.f32 %v1021_v49 }
 0x43d   : > { %v2289_v41 = vpop.eup %1986 }
 0x43e   : > { %v1028_v42 = vsel %vm816_vm2, %v2289_v41, 0.0 }
 0x43f   : > { %1029 = vadd.xlane.f32.xlu0 %v1028_v42 }
 0x441   : > { %v2296_v50 = vpop.eup %1988 }
 0x442   : > { %v1034_v51 = vsel %vm816_vm2, %v2296_v50, 0.0 }
 0x445   : > { %v2300_v52 = vpop.eup %1990 }
 0x446   : > { %v1031_v53 = vsel %vm816_vm2, %v2300_v52, 0.0 }
 0x448   : > { %390 = vrot.lane.b32.xlu1 %v2211_v25, %s2080_s18  ;;  %s2083_s18 = smov [#allocation2]  }
 0x44c   : > { %393 = vrot.lane.b32.xlu1 %v2211_v25, %s2081_s19  ;;  %s2008_s19 = sshll.u32 %s2083_s18, 4  ;;  %s2009_s19 = int_to_ptr.vmem [resolvable:$false] %s2008_s19 }
 0x44d   : > { %p2011_p0 = scmp.lt.s32.totalorder %s2445_s13, %s2009_s19 }
 0x455   : > { %387 = vrot.lane.b32.xlu0 %v2211_v25, %s2082_s20  ;;  %v385_v25 = vpop.permute.xlu1 %384  ;;  %s2010_s20 = scalar_lea.vmem %s2009_s19, 256 }
 0x456   : > { %p2012_p1 = scmp.lt.s32.totalorder %s2010_s20, %s2004_s17 }
 0x458   : > { %p2013_p2 = por %p2012_p1, %p2011_p0 }
 0x45a   : > { %p2014_p3 = pnand %p2013_p2, %p2007_p13 }
 0x470   : > { %1035 = vadd.xlane.f32.xlu1 %v1034_v51 }
 0x474   : > { %1032 = vadd.xlane.f32.xlu0 %v1031_v53 }
 0x4c4   : > { %v1027_v54 = vpop.xlane.xlu1 %1026 }
 0x4c5   : > { %1992 = vrcp.f32 %v1027_v54 }
 0x4c8   : > { %v391_v55 = vpop.permute.xlu1 %390 }
 0x4c9   : > { %v532_v57 = vcombine.low %v385_v25, %v391_v55  ;;  %v533_v58 = vcombine.high %v385_v25, %v391_v55 }
 0x4cb   : > { %v540_v63 = vrot.slane %v532_v57, %v2221_v38  ;;  %v547_v1 = vrot.slane %v533_v58, %v2221_v38 }
 0x4cc   : > { %v1030_v56 = vpop.xlane.xlu0 %1029  ;;  %v394_v59 = vpop.permute.xlu1 %393 }
 0x4cd   : > { %1994 = vrcp.f32 %v1030_v56 }
 0x4cf   : > { %v1993_v28 = vpop.eup %1992 }
 0x4d0   : > { %v388_v60 = vpop.permute.xlu0 %387 }
 0x4d1   : > { %v548_v61 = vcombine.low %v388_v60, %v394_v59  ;;  %v549_v62 = vcombine.high %v388_v60, %v394_v59  ;;  %v1238_v59 = vld [vmem:[%s2489_s3] sm:$0xf] }
 0x4d3   : > { %v556_v2 = vrot.slane %v548_v61, %v2221_v38  ;;  %v563_v3 = vrot.slane %v549_v62, %v2221_v38  ;;  %v1240_v61 = vld [vmem:[%s2489_s3 + $0x8] sm:$0xf]  ;;  %v1241_v62 = vld [vmem:[%s2489_s3 + $0xc] sm:$0xf] }
 0x4d5   : > { %v564_v4 = vcombine.low %v540_v63, %v556_v2  ;;  %v565_v5 = vcombine.high %v540_v63, %v556_v2  ;;  %v580_v6 = vcombine.low %v547_v1, %v563_v3  ;;  %v581_v7 = vcombine.high %v547_v1, %v563_v3 }
 0x4d7   : > { %v572_v9 = vrot.slane %v564_v4, %v2224_v44  ;;  %v579_v10 = vrot.slane %v565_v5, %v2224_v44  ;;  %v588_v11 = vrot.slane %v580_v6, %v2224_v44  ;;  %v595_v12 = vrot.slane %v581_v7, %v2224_v44  ;;  %v1995_v33 = vpop.eup %1994 }
 0x4d8   : > { %v1042_v40 = vmul.f32 %v1995_v33, %v2289_v41  ;;  %v1338_v6 = vsel %vm1052_vm3, %v1240_v61, 0  ;;  %v1384_v7 = vsel %vm1052_vm3, %v1241_v62, 0 }
 0x4d9   : > { %v736_v13 = vcombine.low %v572_v9, %v579_v10  ;;  %v1739_v15 = vcombine.high %v572_v9, %v579_v10  ;;  %v752_v17 = vcombine.low %v588_v11, %v595_v12  ;;  %v1740_v18 = vcombine.high %v588_v11, %v595_v12 }
 0x4da   : > { %v1046_v49 = vpack.c.bf16 %v1042_v40, %v1042_v40 }
 0x4db   : > { %v743_v19 = vrot.slane %v736_v13, %v2221_v38  ;;  %v751_v20 = vrot.slane %v1739_v15, %v2221_v38  ;;  %v759_v21 = vrot.slane %v752_v17, %v2221_v38  ;;  %v767_v22 = vrot.slane %v1740_v18, %v2221_v38 }
 0x4dc   : > { %v1041_v38 = vmul.f32 %v1993_v28, %v2285_v39 }
 0x4dd   : > { %v768_v23 = vcombine.low %v743_v19, %v751_v20  ;;  %v784_v24 = vcombine.low %v759_v21, %v767_v22  ;;  %v769_v26 = vcombine.high %v743_v19, %v751_v20  ;;  %v785_v27 = vcombine.high %v759_v21, %v767_v22 }
 0x4df   : > { %v776_v29 = vrot.slane %v768_v23, %v2224_v44  ;;  %v792_v30 = vrot.slane %v784_v24, %v2224_v44  ;;  %v783_v31 = vrot.slane %v769_v26, %v2224_v44  ;;  %v799_v32 = vrot.slane %v785_v27, %v2224_v44 }
 0x4e0   : > { %v1045_v44 = vpack.c.bf16 %v1041_v38, %v1041_v38 }
 0x4e1   : > { %v800_v34 = vcombine.low %v776_v29, %v792_v30  ;;  %v801_v35 = vcombine.high %v776_v29, %v792_v30  ;;  %v802_v36 = vcombine.low %v783_v31, %v799_v32  ;;  %v803_v37 = vcombine.high %v783_v31, %v799_v32 }
 0x4e3   : > { %v812_v42 = vpack.c.bf16 %v800_v34, %v800_v34  ;;  %v813_v43 = vpack.c.bf16 %v801_v35, %v801_v35  ;;  %v814_v47 = vpack.c.bf16 %v802_v36, %v802_v36  ;;  %v815_v48 = vpack.c.bf16 %v803_v37, %v803_v37 }
 0x4e5   : > { %v1054_v45 = vsel %vm1052_vm3, %v812_v42, 0  ;;  %v1100_v46 = vsel %vm1052_vm3, %v813_v43, 0  ;;  %v1146_v39 = vsel %vm1052_vm3, %v814_v47, 0  ;;  %v1192_v41 = vsel %vm1052_vm3, %v815_v48, 0 }
 0x4e6   : > { %1841 = vmatpush3.bf16.msra.mxu1 %v1054_v45  ;;  %1847 = vmatpush3.bf16.msra.mxu0 %v1100_v46  ;;  %v1435_v42 = vsub.s32 4, %v2197_v14 }
 0x4e7   : > { %1852 = vmatprep.subr.bf16.mxu1 %v2068_v8  ;;  %1858 = vmatprep.subr.bf16.mxu0 %v2068_v8 }
 0x4e9   : > { %1843 = vmatmul.mubr.msk.bf16.vlgmr.msra.gmra.mrb[16].mxu1 %vm816_vm2, %v1045_v44  ;;  %1849 = vmatmul.mubr.msk.bf16.vlgmr.msra.gmra.mrb[4].mxu0 %vm816_vm2, %v1046_v49  ;;  %v1436_v44 = vrot.slane %v2203_v16, %v1435_v42 }
 0x4ea   : > { %1853 = vmatpush3.bf16.msra.mxu1 %v1146_v39  ;;  %1859 = vmatpush3.bf16.msra.mxu0 %v1192_v41 }
 0x4eb   : > { %1860 = vmatprep.mubr.msk.bf16.mxu0 %vm2069_vm1, %v2068_v8  ;;  %1854 = vmatprep.mubr.msk.bf16.mxu1 %vm2069_vm1, %v2068_v8 }
 0x4ec   : > { %1864 = vmatprep.subr.bf16.mxu1 %v2068_v8  ;;  %1870 = vmatprep.subr.bf16.mxu0 %v2068_v8 }
 0x4fd   : > { %v1036_v51 = vpop.xlane.xlu1 %1035 }
 0x4fe   : > { %1996 = vrcp.f32 %v1036_v51 }
 0x501   : > { %v1033_v53 = vpop.xlane.xlu0 %1032 }
 0x502   : > { %1998 = vrcp.f32 %v1033_v53 }
 0x508   : > { %v1997_v25 = vpop.eup %1996 }
 0x509   : > { %v1044_v54 = vmul.f32 %v1997_v25, %v2296_v50  ;;  %v1239_v50 = vld [vmem:[%s2489_s3 + $0x4] sm:$0xf] }
 0x50a   : > { %v1292_v60 = vsel %vm1052_vm3, %v1239_v50, 0  ;;  %v1972_v50 = vld [vmem:[%s2490_s4] sm:$0xff]  }
 0x50b   : > { %v1048_v55 = vpack.c.bf16 %v1044_v54, %v1044_v54 }
 0x50c   : > { %v1999_v56 = vpop.eup %1998 }
 0x50d   : > { %v1043_v57 = vmul.f32 %v1999_v56, %v2300_v52  ;;  %1861 = vmatmul.mubr.msk.bf16.vlgmr.msra.gmra.mrb[8].mxu0 %vm816_vm2, %v1048_v55  ;;  %v1246_v52 = vsel %vm1052_vm3, %v1238_v59, 0 }
 0x50e   : > { %1872 = vmatprep.mubr.msk.bf16.mxu0 %vm2069_vm1, %v2068_v8  ;;  %1871 = vmatpush3.bf16.msra.mxu0 %v1292_v60 }
 0x50f   : > { %v1047_v58 = vpack.c.bf16 %v1043_v57, %v1043_v57  ;;  %1882 = vmatprep.subr.bf16.mxu0 %v2068_v8 }
 0x511   : > { %1855 = vmatmul.mubr.msk.bf16.vlgmr.msra.gmra.mrb[20].mxu1 %vm816_vm2, %v1047_v58 }
 0x512   : > { %1866 = vmatprep.mubr.msk.bf16.mxu1 %vm2069_vm1, %v2068_v8  ;;  %1865 = vmatpush3.bf16.msra.mxu1 %v1246_v52  ;;  %v1974_v52 = vld [vmem:[%s2492_s6] sm:$0xff]  }
 0x513   : > { %1876 = vmatprep.subr.bf16.mxu1 %v2068_v8 }
 0x5bc   : > { %v1090_v63 = vpop.f32.mrb[16].mxu1  ;;  %v1136_v1 = vpop.f32.mrb[4].mxu0 }
 0x5bd   : > { %v1234_v2 = vpack.c.bf16 %v1090_v63, %v1090_v63  ;;  %v1235_v3 = vpack.c.bf16 %v1136_v1, %v1136_v1  ;;  %v1844_v4 = vpop.f32.mrb[17].mxu1  ;;  %v1850_v5 = vpop.f32.mrb[5].mxu0  ;;  %v1454_v63 = vsub.s32 2, %v2197_v14  ;;  %v1459_v1 = vsub.s32 3, %v2197_v14 }
 0x5be   : > { %v1093_v9 = vpop.f32.mrb[18].mxu1  ;;  %v1139_v10 = vpop.f32.mrb[6].mxu0 }
 0x5bf   : > { %v1845_v11 = vpop.f32.mrb[19].mxu1  ;;  %v1851_v12 = vpop.f32.mrb[7].mxu0  ;;  %1867 = vmatmul.mubr.msk.bf16.vlgmr.msra.gmra.mrb[24].mxu1 %vm816_vm2, %v1234_v2  ;;  %1873 = vmatmul.mubr.msk.bf16.vlgmr.msra.gmra.mrb[12].mxu0 %vm816_vm2, %v1235_v3  ;;  %v1455_v2 = vrot.slane %v2203_v16, %v1454_v63  ;;  %v1460_v5 = vrot.slane %v2203_v16, %v1459_v1  ;;  %v1975_v10 = vld [vmem:[%s2492_s6 + $0x8] sm:$0xff]  }
 0x5c0   : > { %1877 = vmatpush3.bf16.msra.mxu1 %v1338_v6  ;;  %1883 = vmatpush3.bf16.msra.mxu0 %v1384_v7  ;;  %v1976_v11 = vld [vmem:[%s2492_s6 + $0x10] sm:$0xff]   ;;  %v1977_v12 = vld [vmem:[%s2492_s6 + $0x18] sm:$0xff]  }
 0x5c1   : > { %1884 = vmatprep.mubr.msk.bf16.mxu0 %vm2069_vm1, %v2068_v8  ;;  %1878 = vmatprep.mubr.msk.bf16.mxu1 %vm2069_vm1, %v2068_v8 }
 0x5c2   : > { %1888 = vmatprep.subr.bf16.mxu1 %v2068_v8  ;;  %1896 = vmatprep.subr.bf16.mxu0 %v2068_v8 }
 0x5e0   : > { %v1228_v13 = vpop.f32.mrb[8].mxu0 }
 0x5e1   : > { %v1237_v15 = vpack.c.bf16 %v1228_v13, %v1228_v13  ;;  %v1862_v17 = vpop.f32.mrb[9].mxu0  ;;  %v1978_v13 = vld [vmem:[%s2492_s6 + $0x20] sm:$0xff]  }
 0x5e2   : > { %v1231_v18 = vpop.f32.mrb[10].mxu0  ;;  %v1980_v17 = vld [vmem:[%s2492_s6 + $0x30] sm:$0xff]  }
 0x5e3   : > { %v1863_v19 = vpop.f32.mrb[11].mxu0  ;;  %1885 = vmatmul.mubr.msk.bf16.vlgmr.msra.gmra.mrb[16].mxu0 %vm816_vm2, %v1237_v15  ;;  %v1979_v15 = vld [vmem:[%s2492_s6 + $0x28] sm:$0xff]   ;;  %v1981_v18 = vld [vmem:[%s2492_s6 + $0x38] sm:$0xff]  }
 0x5e4   : > { %v1182_v20 = vpop.f32.mrb[20].mxu1  ;;  %1912 = vmatprep.mubr.msk.bf16.mxu0 %vm2069_vm1, %v2068_v8  ;;  %1897 = vmatpush3.bf16.msra.mxu0 %v1974_v52  ;;  %v1753_v19 = vld [vmem:[%s2491_s5] ss:$0 sm:$0xff] }
 0x5e5   : > { %v1236_v21 = vpack.c.bf16 %v1182_v20, %v1182_v20  ;;  %v1856_v22 = vpop.f32.mrb[21].mxu1  ;;  %1898 = vmatprep.subr.bf16.mxu0 %v2068_v8 }
 0x5e6   : > { %v1185_v23 = vpop.f32.mrb[22].mxu1 }
 0x5e7   : > { %v1857_v24 = vpop.f32.mrb[23].mxu1  ;;  %1879 = vmatmul.mubr.msk.bf16.vlgmr.msra.gmra.mrb[28].mxu1 %vm816_vm2, %v1236_v21 }
 0x5e8   : > { %1892 = vmatprep.mubr.msk.bf16.mxu1 %vm2069_vm1, %v2068_v8  ;;  %1889 = vmatpush3.bf16.msra.mxu1 %v1972_v50 }
 0x5e9   : > { %1890 = vmatprep.subr.bf16.mxu1 %v2068_v8  ;;  %1899 = vmatpush3.bf16.msra.mxu0 %v1975_v10 }
 0x5ea   : > { %1900 = vmatprep.subr.bf16.mxu0 %v2068_v8 }
 0x5ed   : > { %1901 = vmatpush3.bf16.msra.mxu0 %v1976_v11 }
 0x5ee   : > { %1902 = vmatprep.subr.bf16.mxu0 %v2068_v8 }
 0x5f1   : > { %1903 = vmatpush3.bf16.msra.mxu0 %v1977_v12 }
 0x5f2   : > { %1904 = vmatprep.subr.bf16.mxu0 %v2068_v8 }
 0x5f5   : > { %1905 = vmatpush3.bf16.msra.mxu0 %v1978_v13 }
 0x5f6   : > { %1906 = vmatprep.subr.bf16.mxu0 %v2068_v8 }
 0x5f9   : > { %1907 = vmatpush3.bf16.msra.mxu0 %v1979_v15 }
 0x5fa   : > { %1908 = vmatprep.subr.bf16.mxu0 %v2068_v8 }
 0x5fd   : > { %1909 = vmatpush3.bf16.msra.mxu0 %v1980_v17 }
 0x5fe   : > { %1910 = vmatprep.subr.bf16.mxu0 %v2068_v8 }
 0x601   : > { %1911 = vmatpush3.bf16.msra.mxu0 %v1981_v18 }
 0x692   : > { %v1282_v26 = vpop.f32.mrb[24].mxu1  ;;  %v1328_v27 = vpop.f32.mrb[12].mxu0 }
 0x693   : > { %v1426_v28 = vsel %vm277_vm0, %v1282_v26, 0.0  ;;  %v1427_v29 = vsel %vm277_vm0, %v1328_v27, 0.0  ;;  %v1868_v30 = vpop.f32.mrb[25].mxu1  ;;  %v1874_v31 = vpop.f32.mrb[13].mxu0 }
 0x694   : > { %v1428_v32 = vadd.f32 %v1427_v29, %v1426_v28  ;;  %v1285_v33 = vpop.f32.mrb[26].mxu1  ;;  %v1331_v34 = vpop.f32.mrb[14].mxu0 }
 0x695   : > { %v1869_v35 = vpop.f32.mrb[27].mxu1  ;;  %v1875_v36 = vpop.f32.mrb[15].mxu0 }
 0x696   : > { %v1557_v35 = vsub.s32 5, %v2197_v14 }
 0x698   : > { %v1558_v36 = vrot.slane %v2203_v16, %v1557_v35 }
 0x6b6   : > { %v1420_v37 = vpop.f32.mrb[16].mxu0 }
 0x6b7   : > { %v1886_v38 = vpop.f32.mrb[17].mxu0  ;;  %v1431_v39 = vsel %vm277_vm0, %v1420_v37, 0.0 }
 0x6b8   : > { %v1423_v40 = vpop.f32.mrb[18].mxu0 }
 0x6b9   : > { %v1887_v43 = vpop.f32.mrb[19].mxu0 }
 0x6ba   : > { %v1374_v45 = vpop.f32.mrb[28].mxu1 }
 0x6bb   : > { %v1429_v46 = vsel %vm277_vm0, %v1374_v45, 0.0  ;;  %v1880_v47 = vpop.f32.mrb[29].mxu1 }
 0x6bc   : > { %v1430_v48 = vadd.f32 %v1429_v46, %v1428_v32  ;;  %v1377_v49 = vpop.f32.mrb[30].mxu1 }
 0x6bd   : > { %v1881_v41 = vpop.f32.mrb[31].mxu1 }
 0x6be   : > { %v1432_v51 = vadd.f32 %v1431_v39, %v1430_v48 }
 0x6c0   : > { %v1437_v53 = vadd.f32 %v1436_v44, %v1432_v51 }
 0x6c2   : > { %v2383_v25 = vadd.f32 %v1437_v53, %v2177_v0  ;;  %v1973_v0 = vld [vmem:[%s2490_s4 + $0x8] sm:$0xff]  }
 0x6c3   : > { %1891 = vmatpush3.bf16.msra.mxu1 %v1973_v0 }
 0x6c4   : > { %v1439_v54 = vsel %vm277_vm0, %v2383_v25, 0.0 }
 0x6c5   : > { %1440 = vadd.xlane.f32.xlu0 %v1439_v54 }
 0x752   : > { %v1441_v55 = vpop.xlane.xlu0 %1440 }
 0x753   : > { %v1442_v56 = vmul.f32 0.03125, %v1441_v55 }
 0x755   : > { %v1443_v57 = vsub.f32 %v2383_v25, %v1442_v56 }
 0x757   : > { %v1444_v58 = vmul.f32 %v1443_v57, %v1443_v57 }
 0x759   : > { %v1445_v59 = vsel %vm277_vm0, %v1444_v58, 0.0 }
 0x75a   : > { %1446 = vadd.xlane.f32.xlu0 %v1445_v59 }
 0x7e7   : > { %v1447_v60 = vpop.xlane.xlu0 %1446 }
 0x7e8   : > { %v1448_v61 = vmul.f32 0.03125, %v1447_v60 }
 0x7ea   : > { %v1449_v62 = vadd.f32 1e-05, %v1448_v61 }
 0x7ec   : > { %2000 = vrsqrt.f32 %v1449_v62 }
 0x7f6   : > { %v2001_v3 = vpop.eup %2000 }
 0x7f7   : > { %v1451_v4 = vmul.f32 %v2001_v3, %v1443_v57 }
 0x7f9   : > { %v1456_v6 = vmul.f32 %v1455_v2, %v1451_v4 }
 0x7fb   : > { %v1461_v7 = vadd.f32 %v1460_v5, %v1456_v6 }
 0x7fd   : > { %v1462_v9 = vpack.c.bf16 %v1461_v7, %v1461_v7 }
 0x7ff   : > { %1893 = vmatmul.mubr.msk.bf16.vlgmr.msra.gmra.mrb[32].mxu1 %vm277_vm0, %v1462_v9 }
 0x8d2   : > { %v1523_v20 = vpop.f32.mrb[32].mxu1 }
 0x8d3   : > { %v1524_v21 = vadd.f32 %v1753_v19, %v1523_v20  ;;  %v1894_v22 = vpop.f32.mrb[33].mxu1 }
 0x8d4   : > { %v1526_v23 = vpop.f32.mrb[34].mxu1 }
 0x8d5   : > { %v1530_v24 = vmul.f32 0.044715, %v1524_v21  ;;  %v1895_v26 = vpop.f32.mrb[35].mxu1  ;;  %v1529_v8 = vmul.f32 0.5, %v1524_v21 }
 0x8d7   : > { %v1531_v27 = vmul.f32 %v1530_v24, %v1524_v21 }
 0x8d9   : > { %v1532_v28 = vmul.f32 %v1531_v27, %v1524_v21 }
 0x8db   : > { %v1533_v29 = vadd.f32 %v1532_v28, %v1524_v21 }
 0x8dd   : > { %v1534_v30 = vmul.f32 0.7978846, %v1533_v29 }
 0x8df   : > { %2002 = vtanh.f32 %v1534_v30 }
 0x8e9   : > { %v2003_v31 = vpop.eup %2002 }
 0x8ea   : > { %v1536_v32 = vadd.f32 1.0, %v2003_v31 }
 0x8ec   : > { %v1537_v33 = vmul.f32 %v1536_v32, %v1529_v8 }
 0x8ee   : > { %v1538_v34 = vpack.c.bf16 %v1537_v33, %v1537_v33 }
 0x8f0   : > { %1913 = vmatmul.mubr.bf16.vlgmr.msra.gmra.mrb[20].mxu0 %v1538_v34 }
 0x9c3   : > { %v1641_v37 = vpop.f32.mrb[20].mxu0 }
 0x9c4   : > { %v1642_v38 = vadd.f32 %v1641_v37, %v1558_v36  ;;  %v1914_v40 = vpop.f32.mrb[21].mxu0 }
 0x9c5   : > { %v1644_v42 = vpop.f32.mrb[22].mxu0 }
 0x9c6   : > { %v1647_v43 = vadd.f32 %v1642_v38, %v2383_v25  ;;  %v1915_v45 = vpop.f32.mrb[23].mxu0 }
 0x9c8   : > { %1648 = vst.msk [vmem:[%s269_s9] sm:$0xff] %vm277_vm0, %v1647_v43 }
 0x9c9   : > { %2017 = shalt.err (!%p2014_p3)
}
 0x9ca   : > { %s2018_s21 = scalar_lea.hbm %s2443_s16, 128  ;;  %s2022_s29 = scalar_lea.hbm %s2493_s7, 256 }
 0x9cb   : > { %p2019_p4 = scmp.ne.s32.totalorder %s2443_s16, %s2018_s21  ;;  %p2023_p9 = scmp.lt.u32.totalorder %s2443_s16, %s2493_s7 }
 0x9cc   : > { %p2024_p10 = scmp.lt.u32.totalorder %s2022_s29, %s2018_s21  ;;  %p2026_p12 = scmp.lt.u32.totalorder %s2018_s21, %s2443_s16 }
 0x9cd   : > { %p2020_p7 = pnand %p2019_p4, %p2162_p5 }
 0x9ce   : > { %p2025_p11 = por %p2024_p10, %p2023_p9 }
 0x9cf   : > { %p2021_p8 = pneg %p2020_p7 }
 0x9d0   : > { %p2027_p13 = por %p2026_p12, %p2025_p11 }
 0x9d2   : > { %p2028_p0 = pnand %p2027_p13, %p2021_p8 }
 0x9d4   : > { %2031 = shalt.err (!%p2028_p0)
}
 0x9d5   : > { %1916 = dma.vmem_to_hbm [thread:$0]  (%p2162_p5), %s2445_s13, 128, %s2443_s16, %s1650_s28  }
 0x9d6 PF: > { %p1922_p1 = scmp.ge.s32.totalorder %s2066_s27, 2  ;;  %s1675_s14 = sand.u32 1, %s2054_s24  }
 0x9d7   : > { %s1676_s15 = scalar_lea.sflag [#allocation3], %s1675_s14 }
 0x9d8   : > { %p1919_p2 = pnand %p1922_p1, %p2166_p6 }
 0x9da   : > { %2049 = dma.done.wait (!%p1919_p2), %s1676_s15, 128  }
 0x9db   : > { %2051 = vsyncadd (!%p1919_p2), %s1676_s15, 4294967168  ;;  %p17_p3 = scmp.ge.s32.totalorder %s2149_s30, 4   ;;  %s2496_s24 = smov %s2058_s25 }
 0x9dc   : > { %s2497_s25 = smov %s2062_s26  ;;  %s2498_s26 = smov %s2160_s10 }
 0x9dd   : > { %s2499_s27 = smov %s2149_s30  ;;  %19 = sbr.rel (!%p17_p3) target bundleno = 3 (0x3), region = 83 }
 0x9e4   :  { %1681 = vsyncpa [#allocation3], 1 }
 0x9e5   :  { %1683 = vsyncpa [#allocation3 + $0x1], 1 }

</bundles_post_ra>
